<compile_context>
chip_gen: v6e
topology: v6e:2x2x1
jax: 0.10.0
libtpu: 0.0.40
codegen_flags: <defaults>
</compile_context>

<pallas_src>
import functools

import jax
import jax.numpy as jnp
from jax import lax
from jax.experimental import pallas as pl
from jax.experimental.pallas import tpu as pltpu


# ----------------------------- Pallas kernel ------------------------------ #

def _fused_mean_linear_kernel(x_ref, wt_ref, b_ref, o_ref):
    # x_ref:  (TN, K)  bf16   -- flattened (E*F) activations, lane-dense
    # wt_ref: (L, K)   f32    -- transposed, mean-folded weight (resident)
    # b_ref:  (L, 1)   f32
    # o_ref:  (L, TN)  f32    -- transposed output (lane-dense store)
    x = x_ref[...].astype(jnp.float32)
    y_t = lax.dot_general(
        wt_ref[...], x,
        dimension_numbers=(((1,), (1,)), ((), ())),   # contract K with K
        preferred_element_type=jnp.float32)           # (L, TN)
    o_ref[...] = (y_t + b_ref[...]).astype(o_ref.dtype)


def fused_mean_linear(x, w_big, b, *, tile_n=1024):
    """y = x @ w_big + b  computed tile-by-tile on the MXU.

    x:     (N, K)  activations (bf16 or f32), K = E*F
    w_big: (K, L)  f32 weight with the 1/E mean already folded in
    b:     (L,)    f32 bias
    returns (N, L) f32
    """
    N, K = x.shape
    L = w_big.shape[1]

    # Tile size: multiple of 128 (lane-dense transposed store), clamped to the
    # (row-padded) problem size so tiny batches don't over-pad.
    tile_n = max(128, min(tile_n, pl.cdiv(N, 128) * 128))
    n_pad = pl.cdiv(N, tile_n) * tile_n
    if n_pad != N:
        x = jnp.pad(x, ((0, n_pad - N), (0, 0)))

    wt = w_big.T                      # (L, K)
    b2 = b.reshape(L, 1)

    out_t = pl.pallas_call(
        _fused_mean_linear_kernel,
        out_shape=jax.ShapeDtypeStruct((L, n_pad), jnp.float32),
        grid_spec=pltpu.PrefetchScalarGridSpec(
            num_scalar_prefetch=0,
            grid=(n_pad // tile_n,),
            in_specs=[
                pl.BlockSpec((tile_n, K), lambda i: (i, 0)),
                pl.BlockSpec((L, K), lambda i: (0, 0)),     # grid-invariant
                pl.BlockSpec((L, 1), lambda i: (0, 0)),     # grid-invariant
            ],
            out_specs=pl.BlockSpec((L, tile_n), lambda i: (0, i)),
        ),
        compiler_params=pltpu.CompilerParams(
            dimension_semantics=("parallel",)),
    )(x, wt, b2)

    return out_t[:, :N].T             # (N, L)


# ------------------------------ JAX "module" ------------------------------ #

def init_params(key, *, cond_vocab, proc_vocab, med_vocab, out_vocab,
                chart_vocab, lab_vocab, eth_vocab, gender_vocab, age_vocab,
                ins_vocab, embed_size, feat_dim):
    ks = jax.random.split(key, 12)

    def emb(k, v):
        return jax.random.normal(k, (v, embed_size), jnp.float32) * 0.02

    latent = embed_size
    bound = 1.0 / jnp.sqrt(feat_dim)
    params = {
        "cond": emb(ks[0], cond_vocab),
        "proc": emb(ks[1], proc_vocab),
        "med": emb(ks[2], med_vocab),
        "out": emb(ks[3], out_vocab),
        "chart": emb(ks[4], chart_vocab),
        "lab": emb(ks[5], lab_vocab),
        "eth": emb(ks[6], eth_vocab),
        "gender": emb(ks[7], gender_vocab),
        "age": emb(ks[8], age_vocab),
        "ins": emb(ks[9], ins_vocab),
        # nn.Linear(F, latent): torch weight is (latent, F); stored (F, latent).
        "lin_w": jax.random.uniform(ks[10], (feat_dim, latent), jnp.float32,
                                    -bound, bound),
        "lin_b": jax.random.uniform(ks[11], (latent,), jnp.float32,
                                    -bound, bound),
    }
    return params


@functools.partial(jax.jit, static_argnames=("vocab_sizes",))
def gnn_base_forward(params, meds, chart, out, proc, lab, conds, demo,
                     vocab_sizes):
    """GNNBase.forward up to the point where the PyTorch code exits."""
    (cond_v, proc_v, med_v, out_v, chart_v, lab_v) = vocab_sizes
    B, T = meds.shape[0], meds.shape[1]          # seq_len = meds.size(1) (= 24)
    E = params["med"].shape[1]
    act_dt = jnp.bfloat16

    meds = jnp.clip(meds, 0, med_v - 1)
    chart = jnp.clip(chart, 0, chart_v - 1)
    out = jnp.clip(out, 0, out_v - 1)
    proc = jnp.clip(proc, 0, proc_v - 1)
    lab = jnp.clip(lab, 0, lab_v - 1)
    conds = jnp.clip(conds, 0, cond_v - 1)

    # Per-group activation slabs, already flattened to (B, T, K_g * E) with
    # the embedding dim innermost (index k*E + e).  This is the lane-dense
    # layout the kernel consumes; the 1/E mean is folded into the weight.
    def seq_group(table, idx):                    # idx: (B, T, K) -> (B, T, K*E)
        return table[idx].reshape(B, T, -1).astype(act_dt)

    med_f = seq_group(params["med"], meds)
    chart_f = seq_group(params["chart"], chart)
    out_f = seq_group(params["out"], out)
    proc_f = seq_group(params["proc"], proc)
    lab_f = params["lab"][lab].reshape(B, T, E).astype(act_dt)          # 1 slot
    cond_f = jnp.broadcast_to(
        params["cond"][conds].reshape(B, 1, -1),
        (B, T, conds.shape[1] * E)).astype(act_dt)

    def demo_group(table, col):                   # (B,) -> (B, T, E)
        return jnp.broadcast_to(table[demo[:, col]][:, None, :],
                                (B, T, E)).astype(act_dt)

    gender_f = demo_group(params["gender"], 0)
    eth_f = demo_group(params["eth"], 1)
    ins_f = demo_group(params["ins"], 2)
    age_f = demo_group(params["age"], 3)

    # Concatenation order matches the torch feature-slot order exactly.
    x = jnp.concatenate([med_f, chart_f, out_f, proc_f, lab_f, cond_f,
                         gender_f, eth_f, ins_f, age_f], axis=-1)  # (B,T,F*E)
    x_flat = x.reshape(B * T, -1)                                  # (N, F*E)

    # mean over E + Linear(F -> L) folded into one weight:
    #   W_big[f*E + e, :] = W[f, :] / E   (exactly matches x_flat's layout)
    w_big = jnp.repeat(params["lin_w"], E, axis=0) / jnp.float32(E)  # (F*E, L)

    return fused_mean_linear(x_flat, w_big, params["lin_b"], tile_n=1024)


# ---------------------- pure-JAX torch-faithful reference ------------------ #

def _torch_reference(params, meds, chart, out, proc, lab, conds, demo,
                     vocab_sizes):
    """mean over E of the concatenated (B,24,E,F) tensor, then Linear (f32)."""
    (cond_v, proc_v, med_v, out_v, chart_v, lab_v) = vocab_sizes
    B, T = meds.shape[0], meds.shape[1]
    meds = jnp.clip(meds, 0, med_v - 1)
    chart = jnp.clip(chart, 0, chart_v - 1)
    out = jnp.clip(out, 0, out_v - 1)
    proc = jnp.clip(proc, 0, proc_v - 1)
    lab = jnp.clip(lab, 0, lab_v - 1)
    conds = jnp.clip(conds, 0, cond_v - 1)

    med_m = params["med"][meds].mean(-1)                       # (B,T,Kmed)
    chart_m = params["chart"][chart].mean(-1)
    out_m = params["out"][out].mean(-1)
    proc_m = params["proc"][proc].mean(-1)
    lab_m = params["lab"][lab].mean(-1)[..., None]              # (B,T,1)
    cond_m = jnp.broadcast_to(params["cond"][conds].mean(-1)[:, None, :],
                              (B, T, conds.shape[1]))

    def demo_m(table, col):
        return jnp.broadcast_to(table[demo[:, col]].mean(-1)[:, None, None],
                                (B, T, 1))

    m = jnp.concatenate([med_m, chart_m, out_m, proc_m, lab_m, cond_m,
                         demo_m(params["gender"], 0), demo_m(params["eth"], 1),
                         demo_m(params["ins"], 2), demo_m(params["age"], 3)],
                        axis=-1)                                # (B,T,F)
    return m.reshape(B * T, -1) @ params["lin_w"] + params["lin_b"]


if __name__ == "__main__":
    key = jax.random.PRNGKey(0)

    # small, forward-consistent shapes
    B, T, E = 2, 24, 16            # seq_len must be 24 (hardcoded in the module)
    K_med, K_chart, K_out, K_proc, K_cond = 3, 3, 3, 3, 2
    cond_v, proc_v, med_v, out_v, chart_v, lab_v = 10, 12, 14, 9, 11, 13
    eth_v, gender_v, age_v, ins_v = 5, 3, 7, 4
    F = K_med + K_chart + K_out + K_proc + 1 + K_cond + 4   # 19

    kp, km, kc, ko, kr, kl, kd, kq = jax.random.split(key, 8)
    params = init_params(kp, cond_vocab=cond_v, proc_vocab=proc_v,
                         med_vocab=med_v, out_vocab=out_v, chart_vocab=chart_v,
                         lab_vocab=lab_v, eth_vocab=eth_v, gender_vocab=gender_v,
                         age_vocab=age_v, ins_vocab=ins_v, embed_size=E,
                         feat_dim=F)

    meds = jax.random.randint(km, (B, T, K_med), 0, med_v, jnp.int32)
    chart = jax.random.randint(kc, (B, T, K_chart), 0, chart_v, jnp.int32)
    out_idx = jax.random.randint(ko, (B, T, K_out), 0, out_v, jnp.int32)
    proc = jax.random.randint(kr, (B, T, K_proc), 0, proc_v, jnp.int32)
    lab = jax.random.randint(kl, (B, T), 0, lab_v, jnp.int32)
    conds = jax.random.randint(kd, (B, K_cond), 0, cond_v, jnp.int32)
    demo = jnp.stack([
        jax.random.randint(kq, (B,), 0, gender_v, jnp.int32),
        jax.random.randint(kq, (B,), 0, eth_v, jnp.int32),
        jax.random.randint(kq, (B,), 0, ins_v, jnp.int32),
        jax.random.randint(kq, (B,), 0, age_v, jnp.int32),
    ], axis=1)                                                # (B, 4)

    vocab_sizes = (cond_v, proc_v, med_v, out_v, chart_v, lab_v)
    y = gnn_base_forward(params, meds, chart, out_idx, proc, lab, conds, demo,
                         vocab_sizes)
    y = jax.block_until_ready(y)
    assert y.shape == (B * T, E), y.shape

    # correctness vs torch-faithful f32 reference (bf16 activations => loose-ish tol)
    y_ref = _torch_reference(params, meds, chart, out_idx, proc, lab, conds,
                             demo, vocab_sizes)
    assert jnp.allclose(y, y_ref, atol=2e-3, rtol=0.0), \
        float(jnp.max(jnp.abs(y - y_ref)))

    print("KERNEL_OK")
</pallas_src>

<mosaic_0001>
module attributes {stable_mosaic.version = 11 : i64} {
  func.func @_fused_mean_linear_kernel(%arg0: i32, %arg1: memref<128x304xbf16, #tpu.memory_space<vmem>>, %arg2: memref<16x304xf32, #tpu.memory_space<vmem>>, %arg3: memref<16x1xf32, #tpu.memory_space<vmem>>, %arg4: memref<16x128xf32, #tpu.memory_space<vmem>>) attributes {dimension_semantics = [#tpu.dimension_semantics<parallel>], iteration_bounds = array<i64: 1>, scalar_prefetch = 0 : i64, scratch_operands = 0 : i64, tpu.core_type = #tpu.core_type<tc>, window_params = [{transform_indices = @transform_0, window_bounds = array<i64: 128, 304>}, {pipeline_mode = #tpu.pipeline_mode<synchronous>, transform_indices = @transform_1, window_bounds = array<i64: 16, 304>}, {pipeline_mode = #tpu.pipeline_mode<synchronous>, transform_indices = @transform_2, window_bounds = array<i64: 16, 1>}, {transform_indices = @transform_3, window_bounds = array<i64: 16, 128>}]} {
    %c0 = arith.constant 0 : index
    %c0_0 = arith.constant 0 : index
    %0 = vector.load %arg1[%c0, %c0_0] : memref<128x304xbf16, #tpu.memory_space<vmem>>, vector<128x304xbf16>
    %1 = arith.extf %0 : vector<128x304xbf16> to vector<128x304xf32>
    %c0_1 = arith.constant 0 : index
    %c0_2 = arith.constant 0 : index
    %2 = vector.load %arg2[%c0_1, %c0_2] : memref<16x304xf32, #tpu.memory_space<vmem>>, vector<16x304xf32>
    %cst = arith.constant dense<0.000000e+00> : vector<16x128xf32>
    %3 = tpu.matmul %2, %1, %cst {dimension_numbers = #tpu.dot_dimension_numbers<[1], [1], [0], [0], [0, 0, 1, 0], [], []>} : vector<16x304xf32>, vector<128x304xf32>, vector<16x128xf32> -> vector<16x128xf32>
    %c0_3 = arith.constant 0 : index
    %c0_4 = arith.constant 0 : index
    %4 = vector.load %arg3[%c0_3, %c0_4] : memref<16x1xf32, #tpu.memory_space<vmem>>, vector<16x1xf32>
    %5 = vector.broadcast %4 : vector<16x1xf32> to vector<16x128xf32>
    %6 = arith.addf %3, %5 : vector<16x128xf32>
    %c0_5 = arith.constant 0 : index
    %c0_6 = arith.constant 0 : index
    %7 = vector.load %arg4[%c0_5, %c0_6] : memref<16x128xf32, #tpu.memory_space<vmem>>, vector<16x128xf32>
    tpu.vector_store %arg4[%c0_5, %c0_6], %6 {strides = array<i32>} : memref<16x128xf32, #tpu.memory_space<vmem>>, vector<16x128xf32>,
    return
  }
  func.func @transform_0(%arg0: i32) -> (i32, i32) {
    %c0_i32 = arith.constant 0 : i32
    %c0_i32_0 = arith.constant 0 : i32
    return %arg0, %c0_i32 : i32, i32
  }
  func.func @transform_1(%arg0: i32) -> (i32, i32) {
    %c0_i32 = arith.constant 0 : i32
    %c0_i32_0 = arith.constant 0 : i32
    %c0_i32_1 = arith.constant 0 : i32
    return %c0_i32, %c0_i32_0 : i32, i32
  }
  func.func @transform_2(%arg0: i32) -> (i32, i32) {
    %c0_i32 = arith.constant 0 : i32
    %c0_i32_0 = arith.constant 0 : i32
    %c0_i32_1 = arith.constant 0 : i32
    return %c0_i32, %c0_i32_0 : i32, i32
  }
  func.func @transform_3(%arg0: i32) -> (i32, i32) {
    %c0_i32 = arith.constant 0 : i32
    %c0_i32_0 = arith.constant 0 : i32
    return %c0_i32, %arg0 : i32, i32
  }
}

</mosaic_0001>

<bundles_post_ra>
// kernel: gnn_base_forward.1
= control target key start
LH: loop header
LB: loop body
LE: loop exit
PB: predicated region body
PF: predicated region fallthrough
CT: control target
= control target key end

     0   :  { %vm112_vm0 = vcmask 392192   ;;  %v396_v3 = vmov 0   ;;  %s553_s0 = inlined_call_operand.vmem [shape: bf16[128,304], index: 0, kind: input, shape index: {}]   ;;  %s554_s1 = inlined_call_operand.vmem [shape: f32[16,304], index: 1, kind: input, shape index: {}]   ;;  %s555_s2 = inlined_call_operand.vmem [shape: f32[16,1], index: 2, kind: input, shape index: {}]   ;;  %s556_s3 = inlined_call_operand.vmem [shape: f32[16,128], index: 3, kind: output, shape index: {}]  }
   0x1   :  { %v44_v0 = vld [vmem:[%s553_s0 + $0xb4] sm:$0xff]  ;;  %v45_v1 = vld [vmem:[%s553_s0 + $0xb0] ss:$12 sps:$4 sm:$0xff]   ;;  %v42_v2 = vld [vmem:[%s553_s0 + $0xa8] sm:$0xff]  ;;  %395 = vset.pattern.permute.xlu0 %v396_v3 }
   0x2   :  { %v92_v4 = vunpack.c.h.bf16 %v44_v0  ;;  %v93_v5 = vunpack.c.h.bf16 %v45_v1  ;;  %v91_v6 = vunpack.c.l.bf16 %v44_v0  ;;  %v89_v7 = vunpack.c.h.bf16 %v42_v2  ;;  %v40_v9 = vld [vmem:[%s553_s0 + $0x9c] sm:$0xff]  ;;  %v41_v10 = vld [vmem:[%s553_s0 + $0x98] ss:$12 sps:$4 sm:$0xff]   ;;  %v38_v14 = vld [vmem:[%s553_s0 + $0x90] sm:$0xff] }
   0x3   :  { %v90_v8 = vunpack.c.l.bf16 %v45_v1  ;;  %v88_v11 = vunpack.c.l.bf16 %v42_v2  ;;  %v86_v12 = vunpack.c.h.bf16 %v40_v9  ;;  %v87_v13 = vunpack.c.h.bf16 %v41_v10  ;;  %v95_v16 = vld [vmem:[%s554_s1 + $0x8] sm:$0xff]  ;;  %v96_v17 = vld [vmem:[%s554_s1 + $0x10] sm:$0xff]  ;;  %v100_v22 = vld [vmem:[%s555_s2] sm:$0xff] }
   0x4   :  { %167 = vmatprep.subr.mxu0 %v92_v4  ;;  %359 = vmatprep.subr.msk.mxu1 %vm112_vm0, %v93_v5  ;;  %v85_v15 = vunpack.c.l.bf16 %v40_v9  ;;  %v83_v18 = vunpack.c.h.bf16 %v38_v14  ;;  %v84_v19 = vunpack.c.l.bf16 %v41_v10  ;;  %v36_v20 = vld [vmem:[%s553_s0 + $0x84] sm:$0xff]  ;;  %v37_v21 = vld [vmem:[%s553_s0 + $0x80] ss:$12 sps:$4 sm:$0xff]   ;;  %v82_v23 = vunpack.c.l.bf16 %v38_v14  ;;  %v34_v27 = vld [vmem:[%s553_s0 + $0x78] sm:$0xff] }
   0x5   :  { %168 = vmatpush1.xpose.msra.mxu0 %v91_v6  ;;  %360 = vmatpush3.xpose.msk.msra.mxu1 %vm112_vm0, %v93_v5  ;;  %v101_v24 = vld [vmem:[%s555_s2 + $0x8] sm:$0xff]  ;;  %v80_v25 = vunpack.c.h.bf16 %v36_v20  ;;  %v81_v26 = vunpack.c.h.bf16 %v37_v21  ;;  %v79_v28 = vunpack.c.l.bf16 %v36_v20  ;;  %v77_v29 = vunpack.c.h.bf16 %v34_v27  ;;  %v30_v36 = vld [vmem:[%s553_s0 + $0x60] sm:$0xff]  ;;  %v28_v40 = vld [vmem:[%s553_s0 + $0x54] sm:$0xff] }
   0x6   :  { %169 = vmatprep.subr.mxu0 %v89_v7  ;;  %361 = vmatprep.subr.msk.mxu1 %vm112_vm0, %v90_v8  ;;  %v78_v30 = vunpack.c.l.bf16 %v37_v21  ;;  %v32_v31 = vld [vmem:[%s553_s0 + $0x6c] sm:$0xff]  ;;  %v33_v32 = vld [vmem:[%s553_s0 + $0x68] ss:$12 sps:$4 sm:$0xff]   ;;  %v76_v33 = vunpack.c.l.bf16 %v34_v27  ;;  %v71_v38 = vunpack.c.h.bf16 %v30_v36  ;;  %v70_v42 = vunpack.c.l.bf16 %v30_v36  ;;  %v24_v49 = vld [vmem:[%s553_s0 + $0x3c] sm:$0xff] }
   0x7   :  { %231 = vmatprep.mubr.f32.mxu0 %v95_v16  ;;  %391 = vmatprep.mubr.msk.f32.mxu1 %vm112_vm0, %v96_v17  ;;  %v74_v34 = vunpack.c.h.bf16 %v32_v31  ;;  %v75_v35 = vunpack.c.h.bf16 %v33_v32  ;;  %v73_v37 = vunpack.c.l.bf16 %v32_v31  ;;  %v72_v39 = vunpack.c.l.bf16 %v33_v32  ;;  %v29_v41 = vld [vmem:[%s553_s0 + $0x50] ss:$12 sps:$4 sm:$0xff]   ;;  %v26_v45 = vld [vmem:[%s553_s0 + $0x48] sm:$0xff]  ;;  %v25_v50 = vld [vmem:[%s553_s0 + $0x38] ss:$12 sps:$4 sm:$0xff]  }
   0x8   :  { %104 = vperm.xlu0 %395, %v100_v22   ;;  %v68_v43 = vunpack.c.h.bf16 %v28_v40  ;;  %v69_v44 = vunpack.c.h.bf16 %v29_v41  ;;  %v67_v46 = vunpack.c.l.bf16 %v28_v40  ;;  %v65_v47 = vunpack.c.h.bf16 %v26_v45  ;;  %v22_v54 = vld [vmem:[%s553_s0 + $0x30] sm:$0xff]  ;;  %v20_v58 = vld [vmem:[%s553_s0 + $0x24] sm:$0xff]  ;;  %v21_v59 = vld [vmem:[%s553_s0 + $0x20] ss:$12 sps:$4 sm:$0xff]  }
   0x9   :  { %170 = vmatpush1.xpose.msra.mxu0 %v88_v11  ;;  %362 = vmatpush3.xpose.msk.msra.mxu1 %vm112_vm0, %v90_v8  ;;  %v66_v48 = vunpack.c.l.bf16 %v29_v41  ;;  %v64_v51 = vunpack.c.l.bf16 %v26_v45  ;;  %v62_v52 = vunpack.c.h.bf16 %v24_v49  ;;  %v63_v53 = vunpack.c.h.bf16 %v25_v50  ;;  %v18_v63 = vld [vmem:[%s553_s0 + $0x18] sm:$0xff]  ;;  %v16_v3 = vld [vmem:[%s553_s0 + $0xc] sm:$0xff]  ;;  %v17_v4 = vld [vmem:[%s553_s0 + $0x8] ss:$12 sps:$4 sm:$0xff]  }
   0xa   :  { %171 = vmatprep.subr.mxu0 %v86_v12  ;;  %363 = vmatprep.subr.msk.mxu1 %vm112_vm0, %v87_v13  ;;  %v61_v55 = vunpack.c.l.bf16 %v24_v49  ;;  %v59_v56 = vunpack.c.h.bf16 %v22_v54  ;;  %v60_v57 = vunpack.c.l.bf16 %v25_v50  ;;  %v58_v60 = vunpack.c.l.bf16 %v22_v54  ;;  %v14_v8 = vld [vmem:[%s553_s0] sm:$0xff]  ;;  %v99_v14 = vld [vmem:[%s554_s1 + $0x28] sm:$0xff]  ;;  %v97_v16 = vld [vmem:[%s554_s1 + $0x18] sm:$0xff] }
   0xb   :  { %v56_v61 = vunpack.c.h.bf16 %v20_v58  ;;  %v57_v62 = vunpack.c.h.bf16 %v21_v59  ;;  %v55_v0 = vunpack.c.l.bf16 %v20_v58  ;;  %v53_v1 = vunpack.c.h.bf16 %v18_v63 }
   0xc   :  { %109 = vperm.xlu0 %395, %v101_v24   ;;  %v54_v2 = vunpack.c.l.bf16 %v21_v59  ;;  %v52_v5 = vunpack.c.l.bf16 %v18_v63  ;;  %v50_v6 = vunpack.c.h.bf16 %v16_v3  ;;  %v51_v7 = vunpack.c.h.bf16 %v17_v4 }
   0xd   :  { %172 = vmatpush1.xpose.msra.mxu0 %v85_v15  ;;  %364 = vmatpush3.xpose.msk.msra.mxu1 %vm112_vm0, %v87_v13  ;;  %v49_v9 = vunpack.c.l.bf16 %v16_v3  ;;  %v47_v10 = vunpack.c.h.bf16 %v14_v8  ;;  %v48_v11 = vunpack.c.l.bf16 %v17_v4  ;;  %v46_v12 = vunpack.c.l.bf16 %v14_v8  ;;  %v94_v13 = vld [vmem:[%s554_s1] sm:$0xff] }
   0xe   :  { %173 = vmatprep.subr.mxu0 %v83_v18  ;;  %365 = vmatprep.subr.msk.mxu1 %vm112_vm0, %v84_v19  ;;  %v98_v15 = vld [vmem:[%s554_s1 + $0x20] sm:$0xff] }
  0x11   :  { %174 = vmatpush1.xpose.msra.mxu0 %v82_v23  ;;  %366 = vmatpush3.xpose.msk.msra.mxu1 %vm112_vm0, %v84_v19 }
  0x12   :  { %175 = vmatprep.subr.mxu0 %v80_v25  ;;  %367 = vmatprep.subr.msk.mxu1 %vm112_vm0, %v81_v26 }
  0x15   :  { %176 = vmatpush1.xpose.msra.mxu0 %v79_v28  ;;  %368 = vmatpush3.xpose.msk.msra.mxu1 %vm112_vm0, %v81_v26 }
  0x16   :  { %177 = vmatprep.subr.mxu0 %v77_v29  ;;  %369 = vmatprep.subr.msk.mxu1 %vm112_vm0, %v78_v30 }
  0x19   :  { %178 = vmatpush1.xpose.msra.mxu0 %v76_v33  ;;  %370 = vmatpush3.xpose.msk.msra.mxu1 %vm112_vm0, %v78_v30 }
  0x1a   :  { %179 = vmatprep.subr.mxu0 %v74_v34  ;;  %371 = vmatprep.subr.msk.mxu1 %vm112_vm0, %v75_v35 }
  0x1d   :  { %180 = vmatpush1.xpose.msra.mxu0 %v73_v37  ;;  %372 = vmatpush3.xpose.msk.msra.mxu1 %vm112_vm0, %v75_v35 }
  0x1e   :  { %181 = vmatprep.subr.mxu0 %v71_v38  ;;  %373 = vmatprep.subr.msk.mxu1 %vm112_vm0, %v72_v39 }
  0x21   :  { %182 = vmatpush1.xpose.msra.mxu0 %v70_v42  ;;  %374 = vmatpush3.xpose.msk.msra.mxu1 %vm112_vm0, %v72_v39 }
  0x22   :  { %183 = vmatprep.subr.mxu0 %v68_v43  ;;  %375 = vmatprep.subr.msk.mxu1 %vm112_vm0, %v69_v44 }
  0x25   :  { %184 = vmatpush1.xpose.msra.mxu0 %v67_v46  ;;  %376 = vmatpush3.xpose.msk.msra.mxu1 %vm112_vm0, %v69_v44 }
  0x26   :  { %185 = vmatprep.subr.mxu0 %v65_v47  ;;  %377 = vmatprep.subr.msk.mxu1 %vm112_vm0, %v66_v48 }
  0x29   :  { %186 = vmatpush1.xpose.msra.mxu0 %v64_v51  ;;  %378 = vmatpush3.xpose.msk.msra.mxu1 %vm112_vm0, %v66_v48 }
  0x2a   :  { %187 = vmatprep.subr.mxu0 %v62_v52  ;;  %379 = vmatprep.subr.msk.mxu1 %vm112_vm0, %v63_v53 }
  0x2d   :  { %188 = vmatpush1.xpose.msra.mxu0 %v61_v55  ;;  %380 = vmatpush3.xpose.msk.msra.mxu1 %vm112_vm0, %v63_v53 }
  0x2e   :  { %189 = vmatprep.subr.mxu0 %v59_v56  ;;  %381 = vmatprep.subr.msk.mxu1 %vm112_vm0, %v60_v57 }
  0x31   :  { %190 = vmatpush1.xpose.msra.mxu0 %v58_v60  ;;  %382 = vmatpush3.xpose.msk.msra.mxu1 %vm112_vm0, %v60_v57 }
  0x32   :  { %191 = vmatprep.subr.mxu0 %v56_v61  ;;  %383 = vmatprep.subr.msk.mxu1 %vm112_vm0, %v57_v62 }
  0x35   :  { %192 = vmatpush1.xpose.msra.mxu0 %v55_v0  ;;  %384 = vmatpush3.xpose.msk.msra.mxu1 %vm112_vm0, %v57_v62 }
  0x36   :  { %193 = vmatprep.subr.mxu0 %v53_v1  ;;  %385 = vmatprep.subr.msk.mxu1 %vm112_vm0, %v54_v2 }
  0x39   :  { %194 = vmatpush1.xpose.msra.mxu0 %v52_v5  ;;  %386 = vmatpush3.xpose.msk.msra.mxu1 %vm112_vm0, %v54_v2 }
  0x3a   :  { %195 = vmatprep.subr.mxu0 %v50_v6  ;;  %387 = vmatprep.subr.msk.mxu1 %vm112_vm0, %v51_v7 }
  0x3d   :  { %196 = vmatpush1.xpose.msra.mxu0 %v49_v9  ;;  %388 = vmatpush3.xpose.msk.msra.mxu1 %vm112_vm0, %v51_v7 }
  0x3e   :  { %197 = vmatprep.subr.mxu0 %v47_v10  ;;  %389 = vmatprep.subr.msk.mxu1 %vm112_vm0, %v48_v11 }
  0x41   :  { %198 = vmatpush1.xpose.msra.mxu0 %v46_v12  ;;  %390 = vmatpush3.xpose.msk.msra.mxu1 %vm112_vm0, %v48_v11 }
  0x44   :  { %232 = vmatmul.mubr.f32.vlgmr.msra.gmra.mxu0 %v94_v13  ;;  %392 = vmatmul.mubr.msk.f32.vlgmr.msra.gmra.mxu1 %vm112_vm0, %v99_v14 }
  0x45   :  { %236 = vmatprep.mubr.f32.mxu0 %v98_v15 }
  0x48   :  { %237 = vmatmul.mubr.f32.gmra.mxu0 %v97_v16 }
  0x83   :  { %v105_v17 = vpop.permute.xlu0 %104 }
  0x87   :  { %v110_v24 = vpop.permute.xlu0 %109 }
 0x104   :  { %v233_v18 = vpop.f32.mrf.mxu0  ;;  %v393_v19 = vpop.f32.mrf.mxu1 }
 0x105   :  { %v234_v20 = vadd.f32 %v233_v18, %v105_v17 }
 0x106   :  { %v235_v21 = vpop.f32.mrf.mxu0  ;;  %v308_v22 = vpop.f32.mrf.mxu1 }
 0x107   :  { %v309_v23 = vadd.f32 %v308_v22, %v234_v20 }
 0x108   :  { %v238_v25 = vpop.f32.mrf.mxu0 }
 0x109   :  { %317 = vst [vmem:[%s556_s3] sm:$0xff] %v309_v23  ;;  %v239_v26 = vadd.f32 %v238_v25, %v110_v24 }
 0x10a   :  { %v240_v27 = vpop.f32.mrf.mxu0 }
 0x10b   :  { %v314_v28 = vadd.f32 %v393_v19, %v239_v26 }
 0x10d   :  { %318 = vst [vmem:[%s556_s3 + $0x8] sm:$0xff] %v314_v28 }

</bundles_post_ra>
